<compile_context>
chip_gen: v6e
topology: v6e:2x2x1
jax: 0.10.0
libtpu: 0.0.40
codegen_flags: <defaults>
</compile_context>

<pallas_src>
import jax
import jax.numpy as jnp
from jax import lax
from jax.experimental import pallas as pl
from jax.experimental.pallas import tpu as pltpu


def rbf_kernel(x_ref, c2x_ref, csq_ref, wt_ref, b_ref, o_ref):
    # x_ref  : (TB, K)   batch tile of inputs
    # c2x_ref: (F, K)    2 * centers (VMEM-resident)
    # csq_ref: (1, F)    ||centers||^2 per center (VMEM-resident)
    # wt_ref : (F, N)    pre-transposed Linear weight (VMEM-resident)
    # b_ref  : (1, N)    bias (VMEM-resident)
    # o_ref  : (TB, N)   output tile (unpadded N)
    x = x_ref[...]

    # 2 * (x . c^T) without an in-kernel transpose: contract the shared feature
    # axis on the MXU.  Centers were pre-scaled by 2 in the wrapper, so the
    # per-step (TB, F) "2 * xc" VPU multiply disappears.
    xc2 = lax.dot_general(
        x, c2x_ref[...],
        dimension_numbers=(((1,), (1,)), ((), ())),
        preferred_element_type=jnp.float32)                   # (TB, F)

    x2 = jnp.sum(x * x, axis=-1, keepdims=True)               # (TB, 1)
    d2 = jnp.maximum(x2 + csq_ref[...] - xc2, 0.0)            # squared cdist
    rbf = jnp.exp(-d2)                                        # (TB, F), EUP

    # Output Linear: rbf @ W^T + b (W already transposed in the wrapper).
    # Everything is f32, so no cast on the store.
    o_ref[...] = jnp.dot(rbf, wt_ref[...],
                         preferred_element_type=jnp.float32) + b_ref[...]


def _auto_tb(batch):
    """Pick the batch tile: multiple of 8, large enough to feed the MXU, and
    (when the batch allows) at least two tiles so v7x can use both TCs."""
    if batch <= 16:
        return ((batch + 7) // 8) * 8
    half = -(-batch // 2)                      # ceil(batch / 2): aim for >= 2 tiles
    if half >= 256:
        # Production-sized batch: multiple of 256 (fills the v6e/v7x 256-row
        # MXU), capped at 1024 rows (~a few MB of VMEM per tile, well under
        # even v7x's 32 MiB scoped default).
        return min(1024, ((half + 255) // 256) * 256)
    return ((half + 7) // 8) * 8


def rbf_forward(x, centers, weight, bias, *, tb=None):
    """x: [B, K], centers: [F, K], weight: [N, F], bias: [N] -> [B, N] f32."""
    B, K = x.shape
    F, K_c = centers.shape
    N, F_w = weight.shape
    assert K == K_c and F == F_w and bias.shape == (N,)

    if tb is None:
        tb = _auto_tb(B)
    grid = pl.cdiv(B, tb)

    # Hoisted, call-static preprocessing (tiny, fused by XLA):
    # TODO(synk): torch module keeps centers in float64 (.double()); the TPU
    # kernel computes in float32.
    x = x.astype(jnp.float32)
    c_f32 = centers.astype(jnp.float32)
    c2x = 2.0 * c_f32                                          # (F, K)
    csq = jnp.sum(c_f32 * c_f32, axis=-1)[None, :]             # (1, F)
    wt = weight.astype(jnp.float32).T                          # (F, N)
    bp = bias.astype(jnp.float32)[None, :]                     # (1, N)

    grid_spec = pltpu.PrefetchScalarGridSpec(
        num_scalar_prefetch=0,
        grid=(grid,),
        in_specs=[
            pl.BlockSpec((tb, K), lambda i: (i, 0)),       # x: tiled over batch
            pl.BlockSpec((F, K), lambda i: (0, 0)),        # 2*centers: resident
            pl.BlockSpec((1, F), lambda i: (0, 0)),        # ||c||^2: resident
            pl.BlockSpec((F, N), lambda i: (0, 0)),        # W^T: resident
            pl.BlockSpec((1, N), lambda i: (0, 0)),        # bias: resident
        ],
        out_specs=pl.BlockSpec((tb, N), lambda i: (i, 0)),  # unpadded output
    )

    return pl.pallas_call(
        rbf_kernel,
        out_shape=jax.ShapeDtypeStruct((B, N), jnp.float32),
        grid_spec=grid_spec,
        compiler_params=pltpu.CompilerParams(
            dimension_semantics=("parallel",)),  # disjoint output tiles
    )(x, c2x, csq, wt, bp)


if __name__ == "__main__":
    # Small shapes consistent with the module.
    B = 32              # batch
    num_inputs = 16
    num_rbf_features = 128
    num_outputs = 8

    key = jax.random.PRNGKey(0)
    kx, kc, kw, kb = jax.random.split(key, 4)

    # Modest scale so the RBF activations are not all ~0.
    x = 0.25 * jax.random.normal(kx, (B, num_inputs), dtype=jnp.float32)
    centers = 0.25 * jax.random.normal(
        kc, (num_rbf_features, num_inputs), dtype=jnp.float32)
    bound = 1.0 / jnp.sqrt(num_rbf_features)
    weight = jax.random.uniform(
        kw, (num_outputs, num_rbf_features),
        minval=-bound, maxval=bound, dtype=jnp.float32)
    bias = jax.random.uniform(
        kb, (num_outputs,), minval=-bound, maxval=bound, dtype=jnp.float32)

    out = rbf_forward(x, centers, weight, bias)   # auto tb -> 16, grid=(2,)
    out = jax.block_until_ready(out)

    # Reference: explicit pairwise squared distances, exp, linear.
    d2_ref = jnp.sum((x[:, None, :] - centers[None, :, :]) ** 2, axis=-1)
    rbf_ref = jnp.exp(-d2_ref)
    ref = rbf_ref @ weight.T + bias

    assert out.shape == (B, num_outputs)
    assert jnp.allclose(out, ref, atol=2e-5, rtol=1e-4), float(
        jnp.max(jnp.abs(out - ref)))

    print("KERNEL_OK")
</pallas_src>

<mosaic_0001>
module attributes {stable_mosaic.version = 11 : i64} {
  func.func @rbf_kernel(%arg0: i32, %arg1: memref<16x16xf32, #tpu.memory_space<vmem>>, %arg2: memref<128x16xf32, #tpu.memory_space<vmem>>, %arg3: memref<1x128xf32, #tpu.memory_space<vmem>>, %arg4: memref<128x8xf32, #tpu.memory_space<vmem>>, %arg5: memref<1x8xf32, #tpu.memory_space<vmem>>, %arg6: memref<16x8xf32, #tpu.memory_space<vmem>>) attributes {dimension_semantics = [#tpu.dimension_semantics<parallel>], iteration_bounds = array<i64: 2>, scalar_prefetch = 0 : i64, scratch_operands = 0 : i64, tpu.core_type = #tpu.core_type<tc>, window_params = [{transform_indices = @transform_0, window_bounds = array<i64: 16, 16>}, {pipeline_mode = #tpu.pipeline_mode<synchronous>, transform_indices = @transform_1, window_bounds = array<i64: 128, 16>}, {pipeline_mode = #tpu.pipeline_mode<synchronous>, transform_indices = @transform_2, window_bounds = array<i64: 1, 128>}, {pipeline_mode = #tpu.pipeline_mode<synchronous>, transform_indices = @transform_3, window_bounds = array<i64: 128, 8>}, {pipeline_mode = #tpu.pipeline_mode<synchronous>, transform_indices = @transform_4, window_bounds = array<i64: 1, 8>}, {transform_indices = @transform_5, window_bounds = array<i64: 16, 8>}]} {
    %c0 = arith.constant 0 : index
    %c0_0 = arith.constant 0 : index
    %0 = vector.load %arg1[%c0, %c0_0] : memref<16x16xf32, #tpu.memory_space<vmem>>, vector<16x16xf32>
    %c0_1 = arith.constant 0 : index
    %c0_2 = arith.constant 0 : index
    %1 = vector.load %arg2[%c0_1, %c0_2] : memref<128x16xf32, #tpu.memory_space<vmem>>, vector<128x16xf32>
    %cst = arith.constant dense<0.000000e+00> : vector<16x128xf32>
    %2 = tpu.matmul %0, %1, %cst {dimension_numbers = #tpu.dot_dimension_numbers<[1], [1], [0], [0], [0, 0, 1, 0], [], []>} : vector<16x16xf32>, vector<128x16xf32>, vector<16x128xf32> -> vector<16x128xf32>
    %3 = arith.mulf %0, %0 : vector<16x16xf32>
    %cst_3 = arith.constant dense<0.000000e+00> : vector<16xf32>
    %4 = vector.multi_reduction <add>, %3, %cst_3 [1] : vector<16x16xf32> to vector<16xf32>
    %5 = vector.shape_cast %4 : vector<16xf32> to vector<16x1xf32>
    %c0_4 = arith.constant 0 : index
    %c0_5 = arith.constant 0 : index
    %6 = vector.load %arg3[%c0_4, %c0_5] : memref<1x128xf32, #tpu.memory_space<vmem>>, vector<1x128xf32>
    %7 = vector.broadcast %5 : vector<16x1xf32> to vector<16x128xf32>
    %8 = vector.broadcast %6 : vector<1x128xf32> to vector<16x128xf32>
    %9 = arith.addf %7, %8 : vector<16x128xf32>
    %10 = arith.subf %9, %2 : vector<16x128xf32>
    %cst_6 = arith.constant 0.000000e+00 : f32
    %11 = vector.broadcast %cst_6 : f32 to vector<16x128xf32>
    %12 = arith.maximumf %10, %11 : vector<16x128xf32>
    %cst_7 = arith.constant 0.000000e+00 : f32
    %13 = vector.broadcast %cst_7 : f32 to vector<16x128xf32>
    %14 = arith.subf %13, %12 : vector<16x128xf32>
    %15 = math.exp %14 : vector<16x128xf32>
    %c0_8 = arith.constant 0 : index
    %c0_9 = arith.constant 0 : index
    %16 = vector.load %arg4[%c0_8, %c0_9] : memref<128x8xf32, #tpu.memory_space<vmem>>, vector<128x8xf32>
    %cst_10 = arith.constant dense<0.000000e+00> : vector<16x8xf32>
    %17 = tpu.matmul %15, %16, %cst_10 {dimension_numbers = #tpu.dot_dimension_numbers<[1], [0], [0], [1], [0, 0, 1, 1], [], []>} : vector<16x128xf32>, vector<128x8xf32>, vector<16x8xf32> -> vector<16x8xf32>
    %c0_11 = arith.constant 0 : index
    %c0_12 = arith.constant 0 : index
    %18 = vector.load %arg5[%c0_11, %c0_12] : memref<1x8xf32, #tpu.memory_space<vmem>>, vector<1x8xf32>
    %19 = vector.broadcast %18 : vector<1x8xf32> to vector<16x8xf32>
    %20 = arith.addf %17, %19 : vector<16x8xf32>
    %c0_13 = arith.constant 0 : index
    %c0_14 = arith.constant 0 : index
    %21 = vector.load %arg6[%c0_13, %c0_14] : memref<16x8xf32, #tpu.memory_space<vmem>>, vector<16x8xf32>
    tpu.vector_store %arg6[%c0_13, %c0_14], %20 {strides = array<i32>} : memref<16x8xf32, #tpu.memory_space<vmem>>, vector<16x8xf32>,
    return
  }
  func.func @transform_0(%arg0: i32) -> (i32, i32) {
    %c0_i32 = arith.constant 0 : i32
    %c0_i32_0 = arith.constant 0 : i32
    return %arg0, %c0_i32 : i32, i32
  }
  func.func @transform_1(%arg0: i32) -> (i32, i32) {
    %c0_i32 = arith.constant 0 : i32
    %c0_i32_0 = arith.constant 0 : i32
    %c0_i32_1 = arith.constant 0 : i32
    return %c0_i32, %c0_i32_0 : i32, i32
  }
  func.func @transform_2(%arg0: i32) -> (i32, i32) {
    %c0_i32 = arith.constant 0 : i32
    %c0_i32_0 = arith.constant 0 : i32
    %c0_i32_1 = arith.constant 0 : i32
    return %c0_i32, %c0_i32_0 : i32, i32
  }
  func.func @transform_3(%arg0: i32) -> (i32, i32) {
    %c0_i32 = arith.constant 0 : i32
    %c0_i32_0 = arith.constant 0 : i32
    %c0_i32_1 = arith.constant 0 : i32
    return %c0_i32, %c0_i32_0 : i32, i32
  }
  func.func @transform_4(%arg0: i32) -> (i32, i32) {
    %c0_i32 = arith.constant 0 : i32
    %c0_i32_0 = arith.constant 0 : i32
    %c0_i32_1 = arith.constant 0 : i32
    return %c0_i32, %c0_i32_0 : i32, i32
  }
  func.func @transform_5(%arg0: i32) -> (i32, i32) {
    %c0_i32 = arith.constant 0 : i32
    %c0_i32_0 = arith.constant 0 : i32
    return %arg0, %c0_i32 : i32, i32
  }
}

</mosaic_0001>

<bundles_post_ra>
// kernel: tpu_custom_call.1
= control target key start
LH: loop header
LB: loop body
LE: loop exit
PB: predicated region body
PF: predicated region fallthrough
CT: control target
= control target key end

     0   :  { %s747_s18 = smov 0   ;;  %s909_s0 = inlined_call_operand.vmem [shape: f32[32,16], index: 0, kind: input, shape index: {}]   ;;  %s910_s1 = inlined_call_operand.vmem [shape: f32[128,16], index: 1, kind: input, shape index: {}]   ;;  %s911_s2 = inlined_call_operand.vmem [shape: f32[1,128], index: 2, kind: input, shape index: {}]   ;;  %s912_s3 = inlined_call_operand.vmem [shape: f32[128,8], index: 3, kind: input, shape index: {}]   ;;  %s913_s4 = inlined_call_operand.vmem [shape: f32[1,8], index: 4, kind: input, shape index: {}]   ;;  %s914_s5 = inlined_call_operand.vmem [shape: f32[32,8], index: 5, kind: output, shape index: {}]  }
   0x1 LB: > { %s560_s19 = sadd.s32 4294967295, %s715_s18   ;;  %p564_p0 = scmp.ge.s32.totalorder %s715_s18, 1  ;;  %s715_s18 = sphi %s747_s18, %s15_s18  }
   0x2   : > { %p188_p1 = scmp.lt.s32.totalorder %s715_s18, 3 }
   0x4   : > { %p189_p2 = pnand %p564_p0, %p188_p1 }
   0x5   : > { %s565_s24 = sshll.u32 (!%p189_p2), %s560_s19, 1 }
   0x6   : > { %192 = sbr.rel (%p189_p2) target bundleno = 492 (0x1ec), region = 40  ;;  %p217_p3 = scmp.lt.s32.totalorder (!%p189_p2), %s565_s24, 3 }
   0xb   : > { %v245_v0 = vld [vmem:[%s910_s1 + $0x78] sm:$0xff]  ;;  %vm246_vm0 = vcmask 130048   ;;  %v244_v1 = vld [vmem:[%s910_s1 + $0x70] sm:$0xff]  ;;  %s916_s24 = smov (!%p217_p3, %s565_s24), 3  ;;  %v243_v2 = vld [vmem:[%s910_s1 + $0x68] sm:$0xff]  ;;  %vm501_vm1 = vcmask 64512  }
   0xc   : > { %627 = vmatprep.subr.msk.mxu0 %vm246_vm0, %v245_v0  ;;  %s566_s27 = sshll.u32 %s916_s24, 3  ;;  %v418_v3 = vld [vmem:[%s912_s3 + $0x78] sm:$0xff]  ;;  %v242_v6 = vld [vmem:[%s910_s1 + $0x60] sm:$0xff]  ;;  %v240_v12 = vld [vmem:[%s910_s1 + $0x50] sm:$0xff] }
   0xd   : > { %628 = vmatpush3.xpose.msk.msra.mxu0 %vm246_vm0, %v245_v0  ;;  %s220_s7 = scalar_lea.vmem %s909_s0, %s566_s27  ;;  %662 = vmatprep.subr.mxu1 %v418_v3  ;;  %v241_v10 = vld [vmem:[%s910_s1 + $0x58] sm:$0xff]  ;;  %v239_v13 = vld [vmem:[%s910_s1 + $0x48] sm:$0xff]  ;;  %v417_v14 = vld [vmem:[%s912_s3 + $0x70] sm:$0xff]  ;;  %s226_s29 = scalar_lea.vmem %s914_s5, %s566_s27 }
   0xe   : > { %629 = vmatprep.subr.msk.mxu0 %vm246_vm0, %v244_v1  ;;  %v228_v4 = vld [vmem:[%s220_s7] sm:$0xff]  ;;  %v229_v5 = vld [vmem:[%s220_s7 + $0x8] sm:$0xff]  ;;  %663 = vmatpush3.msra.mxu1 %v418_v3  ;;  %v237_v17 = vld [vmem:[%s910_s1 + $0x38] sm:$0xff] }
   0xf   : > { %659 = vmatprep.mubr.msk.f32.mxu0 %vm246_vm0, %v228_v4  ;;  %v376_v7 = vmul.f32 %v228_v4, %v228_v4  ;;  %v377_v8 = vmul.f32 %v229_v5, %v229_v5  ;;  %v416_v15 = vld [vmem:[%s912_s3 + $0x68] sm:$0xff]  ;;  %664 = vmatprep.subr.mxu1 %v417_v14  ;;  %v238_v16 = vld [vmem:[%s910_s1 + $0x40] sm:$0xff]  ;;  %v236_v18 = vld [vmem:[%s910_s1 + $0x30] sm:$0xff] }
  0x10   : > { %665 = vmatpush3.msra.mxu1 %v417_v14  ;;  %v235_v19 = vld [vmem:[%s910_s1 + $0x28] sm:$0xff]  ;;  %v234_v20 = vld [vmem:[%s910_s1 + $0x20] sm:$0xff]  ;;  %v233_v21 = vld [vmem:[%s910_s1 + $0x18] sm:$0xff] }
  0x11   : > { %630 = vmatpush3.xpose.msk.msra.mxu0 %vm246_vm0, %v244_v1  ;;  %v378_v9 = vsel %vm246_vm0, %v376_v7, 0.0  ;;  %v381_v11 = vsel %vm246_vm0, %v377_v8, 0.0  ;;  %666 = vmatprep.subr.mxu1 %v416_v15  ;;  %v232_v22 = vld [vmem:[%s910_s1 + $0x10] sm:$0xff]  ;;  %v231_v23 = vld [vmem:[%s910_s1 + $0x8] sm:$0xff]  ;;  %v230_v24 = vld [vmem:[%s910_s1] sm:$0xff] }
  0x12   : > { %631 = vmatprep.subr.msk.mxu0 %vm246_vm0, %v243_v2  ;;  %379 = vadd.xlane.f32.xlu0 %v378_v9  ;;  %v415_v25 = vld [vmem:[%s912_s3 + $0x60] sm:$0xff]  ;;  %v414_v26 = vld [vmem:[%s912_s3 + $0x58] sm:$0xff]  ;;  %v413_v27 = vld [vmem:[%s912_s3 + $0x50] sm:$0xff] }
  0x13   : > { %667 = vmatpush3.msra.mxu1 %v416_v15  ;;  %v412_v28 = vld [vmem:[%s912_s3 + $0x48] sm:$0xff]  ;;  %v411_v29 = vld [vmem:[%s912_s3 + $0x40] sm:$0xff]  ;;  %v410_v30 = vld [vmem:[%s912_s3 + $0x38] sm:$0xff] }
  0x14   : > { %668 = vmatprep.subr.mxu1 %v415_v25  ;;  %v409_v31 = vld [vmem:[%s912_s3 + $0x30] sm:$0xff]  ;;  %v408_v32 = vld [vmem:[%s912_s3 + $0x28] sm:$0xff]  ;;  %v407_v33 = vld [vmem:[%s912_s3 + $0x20] sm:$0xff] }
  0x15   : > { %632 = vmatpush3.xpose.msk.msra.mxu0 %vm246_vm0, %v243_v2  ;;  %669 = vmatpush3.msra.mxu1 %v415_v25  ;;  %v406_v34 = vld [vmem:[%s912_s3 + $0x18] sm:$0xff]  ;;  %v405_v35 = vld [vmem:[%s912_s3 + $0x10] sm:$0xff]  ;;  %v404_v36 = vld [vmem:[%s912_s3 + $0x8] sm:$0xff] }
  0x16   : > { %633 = vmatprep.subr.msk.mxu0 %vm246_vm0, %v242_v6  ;;  %382 = vadd.xlane.f32.xlu0 %v381_v11  ;;  %v403_v37 = vld [vmem:[%s912_s3] sm:$0xff] }
  0x17   : > { %670 = vmatprep.subr.mxu1 %v414_v26  ;;  %v587_v39 = vld [vmem:[%s911_s2] ss:$0 sm:$0xff] }
  0x18   : > { %671 = vmatpush3.msra.mxu1 %v414_v26  ;;  %v588_v56 = vld [vmem:[%s913_s4] ss:$0 sm:$0xff] }
  0x19   : > { %634 = vmatpush3.xpose.msk.msra.mxu0 %vm246_vm0, %v242_v6  ;;  %672 = vmatprep.subr.mxu1 %v413_v27 }
  0x1a   : > { %635 = vmatprep.subr.msk.mxu0 %vm246_vm0, %v241_v10  ;;  %673 = vmatpush3.msra.mxu1 %v413_v27 }
  0x1b   : > { %674 = vmatprep.subr.mxu1 %v412_v28 }
  0x1c   : > { %675 = vmatpush3.msra.mxu1 %v412_v28 }
  0x1d   : > { %636 = vmatpush3.xpose.msk.msra.mxu0 %vm246_vm0, %v241_v10  ;;  %676 = vmatprep.subr.mxu1 %v411_v29 }
  0x1e   : > { %637 = vmatprep.subr.msk.mxu0 %vm246_vm0, %v240_v12  ;;  %677 = vmatpush3.msra.mxu1 %v411_v29 }
  0x1f   : > { %678 = vmatprep.subr.mxu1 %v410_v30 }
  0x20   : > { %679 = vmatpush3.msra.mxu1 %v410_v30 }
  0x21   : > { %638 = vmatpush3.xpose.msk.msra.mxu0 %vm246_vm0, %v240_v12  ;;  %680 = vmatprep.subr.mxu1 %v409_v31 }
  0x22   : > { %639 = vmatprep.subr.msk.mxu0 %vm246_vm0, %v239_v13  ;;  %681 = vmatpush3.msra.mxu1 %v409_v31 }
  0x23   : > { %682 = vmatprep.subr.mxu1 %v408_v32 }
  0x24   : > { %683 = vmatpush3.msra.mxu1 %v408_v32 }
  0x25   : > { %640 = vmatpush3.xpose.msk.msra.mxu0 %vm246_vm0, %v239_v13  ;;  %684 = vmatprep.subr.mxu1 %v407_v33 }
  0x26   : > { %641 = vmatprep.subr.msk.mxu0 %vm246_vm0, %v238_v16  ;;  %685 = vmatpush3.msra.mxu1 %v407_v33 }
  0x27   : > { %686 = vmatprep.subr.mxu1 %v406_v34 }
  0x28   : > { %687 = vmatpush3.msra.mxu1 %v406_v34 }
  0x29   : > { %642 = vmatpush3.xpose.msk.msra.mxu0 %vm246_vm0, %v238_v16  ;;  %688 = vmatprep.subr.mxu1 %v405_v35 }
  0x2a   : > { %643 = vmatprep.subr.msk.mxu0 %vm246_vm0, %v237_v17  ;;  %689 = vmatpush3.msra.mxu1 %v405_v35 }
  0x2b   : > { %690 = vmatprep.subr.mxu1 %v404_v36 }
  0x2c   : > { %691 = vmatpush3.msra.mxu1 %v404_v36 }
  0x2d   : > { %644 = vmatpush3.xpose.msk.msra.mxu0 %vm246_vm0, %v237_v17  ;;  %692 = vmatprep.subr.mxu1 %v403_v37 }
  0x2e   : > { %645 = vmatprep.subr.msk.mxu0 %vm246_vm0, %v236_v18  ;;  %693 = vmatpush3.msra.mxu1 %v403_v37 }
  0x31   : > { %646 = vmatpush3.xpose.msk.msra.mxu0 %vm246_vm0, %v236_v18 }
  0x32   : > { %647 = vmatprep.subr.msk.mxu0 %vm246_vm0, %v235_v19 }
  0x35   : > { %648 = vmatpush3.xpose.msk.msra.mxu0 %vm246_vm0, %v235_v19 }
  0x36   : > { %649 = vmatprep.subr.msk.mxu0 %vm246_vm0, %v234_v20 }
  0x39   : > { %650 = vmatpush3.xpose.msk.msra.mxu0 %vm246_vm0, %v234_v20 }
  0x3a   : > { %651 = vmatprep.subr.msk.mxu0 %vm246_vm0, %v233_v21 }
  0x3d   : > { %652 = vmatpush3.xpose.msk.msra.mxu0 %vm246_vm0, %v233_v21 }
  0x3e   : > { %653 = vmatprep.subr.msk.mxu0 %vm246_vm0, %v232_v22 }
  0x41   : > { %654 = vmatpush3.xpose.msk.msra.mxu0 %vm246_vm0, %v232_v22 }
  0x42   : > { %655 = vmatprep.subr.msk.mxu0 %vm246_vm0, %v231_v23 }
  0x45   : > { %656 = vmatpush3.xpose.msk.msra.mxu0 %vm246_vm0, %v231_v23 }
  0x46   : > { %657 = vmatprep.subr.msk.mxu0 %vm246_vm0, %v230_v24 }
  0x49   : > { %658 = vmatpush3.xpose.msk.msra.mxu0 %vm246_vm0, %v230_v24 }
  0x4c   : > { %660 = vmatmul.mubr.msk.f32.vlgmr.msra.gmra.mxu0 %vm246_vm0, %v229_v5 }
  0x9b   : > { %v380_v38 = vpop.xlane.xlu0 %379 }
  0x9c   : > { %v391_v43 = vadd.f32 %v587_v39, %v380_v38 }
  0x9f   : > { %v383_v40 = vpop.xlane.xlu0 %382 }
  0xa0   : > { %v392_v41 = vadd.f32 %v587_v39, %v383_v40 }
 0x10c   : > { %v661_v42 = vpop.f32.mrf.mxu0 }
 0x10d   : > { %v394_v44 = vsub.f32 %v392_v41, %v661_v42 }
 0x10e   : > { %v367_v45 = vpop.f32.mrf.mxu0 }
 0x10f   : > { %v396_v46 = vmax.f32 %v394_v44, 0.0  ;;  %v393_v47 = vsub.f32 %v391_v43, %v367_v45 }
 0x111   : > { %v398_v48 = vsub.f32 0.0, %v396_v46  ;;  %v395_v49 = vmax.f32 %v393_v47, 0.0 }
 0x113   : > { %v397_v50 = vsub.f32 0.0, %v395_v49  ;;  %v401_v51 = vmul.f32 1.442695, %v398_v48 }
 0x115   : > { %v399_v52 = vmul.f32 1.442695, %v397_v50 }
 0x117   : > { %705 = vpow2.f32 %v399_v52 }
 0x118   : > { %707 = vpow2.f32 %v401_v51 }
 0x124   : > { %v706_v53 = vpop.eup %705 }
 0x125   : > { %v708_v54 = vpop.eup %707  ;;  %694 = vmatprep.mubr.f32.mxu1 %v706_v53 }
 0x126   : > { %695 = vmatmul.mubr.f32.vlgmr.msra.gmra.mxu1 %v708_v54 }
 0x1e6   : > { %v696_v55 = vpop.f32.mrf.mxu1 }
 0x1e7   : > { %v498_v59 = vadd.f32 %v696_v55, %v588_v56 }
 0x1e8   : > { %v492_v57 = vpop.f32.mrf.mxu1 }
 0x1e9   : > { %v493_v58 = vadd.f32 %v588_v56, %v492_v57  ;;  %503 = vst.msk [vmem:[%s226_s29 + $0x8] sm:$0xff] %vm501_vm1, %v498_v59 }
 0x1eb   : > { %502 = vst.msk [vmem:[%s226_s29] sm:$0xff] %vm501_vm1, %v493_v58 }
 0x1ec PF: > { %s15_s18 = sadd.s32 1, %s715_s18  }
 0x1ed   : > { %p12_p4 = scmp.ge.s32.totalorder %s15_s18, 4  }
 0x1ef   :  { %14 = sbr.rel (!%p12_p4) target bundleno = 1 (0x1), region = 70 }

</bundles_post_ra>
